<compile_context>
chip_gen: v7x
topology: tpu7x:2x2x1
jax: 0.10.0
libtpu: 0.0.40
codegen_flags: <defaults>
</compile_context>

<pallas_src>
import functools

import jax
import jax.numpy as jnp
from jax.experimental import pallas as pl
from jax.experimental.pallas import tpu as pltpu


def _scan_loss_kernel(anchors_ref, neighbors_ref, cons_ref, ent_ref, *,
                      true_b, tb, tiles_per_core, cal_entropy, has_padding):
    c = pl.program_id(0)   # core-partition index ("parallel")
    i = pl.program_id(1)   # batch-tile index within the partition ("arbitrary")

    @pl.when(i == 0)
    def _init():
        cons_ref[0, 0] = 0.0
        if cal_entropy:
            ent_ref[...] = jnp.zeros_like(ent_ref)

    a = anchors_ref[...].astype(jnp.float32)     # (tb, n)
    nb = neighbors_ref[...].astype(jnp.float32)  # (tb, n)

    # Numerically stable, log-space similarity (no softmax division on this path).
    a_max = jnp.max(a, axis=1, keepdims=True)
    n_max = jnp.max(nb, axis=1, keepdims=True)
    a_exp = jnp.exp(a - a_max)
    n_exp = jnp.exp(nb - n_max)
    a_sum = jnp.sum(a_exp, axis=1, keepdims=True)
    n_sum = jnp.sum(n_exp, axis=1, keepdims=True)
    cross = jnp.sum(a_exp * n_exp, axis=1, keepdims=True)

    # Single fused log; cross underflowing to 0 -> -inf -> clamped to -100 (torch BCELoss).
    log_sim = jnp.maximum(jnp.log(cross / (a_sum * n_sum)), -100.0)
    neg_log = -log_sim                                        # (tb, 1)

    if has_padding:
        # (tb,1)-shaped masking only; compiled out entirely when there is no padding.
        row_ids = (c * tiles_per_core + i) * tb + jax.lax.broadcasted_iota(
            jnp.int32, (tb, 1), 0)
        valid = row_ids < true_b                              # (tb, 1) bool
        neg_log = jnp.where(valid, neg_log, 0.0)

    cons_ref[0, 0] += jnp.sum(neg_log)

    if cal_entropy:
        # Only the entropy path needs normalized anchor probabilities.
        # (tb,1) reciprocal is off the hot path; keep exact (approx=True is ~1e-4 rel err).
        inv_a_sum = pl.reciprocal(a_sum, approx=False)
        if has_padding:
            # Zero padded rows via the (tb,1) factor instead of a (tb,n) select.
            inv_a_sum = jnp.where(valid, inv_a_sum, 0.0)
        a_prob = a_exp * inv_a_sum                            # (tb, n)
        ent_ref[...] += jnp.sum(a_prob, axis=0, keepdims=True).reshape(ent_ref.shape)


def _vmem_capacity_bytes():
    try:
        return int(pltpu.get_tpu_info().vmem_capacity_bytes)
    except Exception:
        return 64 * 1024 * 1024   # conservative fallback: v7x per-TensorCore VMEM


def scan_loss(anchors, neighbors, cal_entropy=False, entropy_weight=2.0,
              max_tile_rows=None, num_core_partitions=2):
    """Pallas implementation of SCANLoss.forward."""
    assert anchors.shape == neighbors.shape and anchors.ndim == 2
    b, n = anchors.shape
    in_itemsize = jnp.dtype(anchors.dtype).itemsize

    # ---- VMEM-budget-aware batch tile --------------------------------------
    vmem_cap = _vmem_capacity_bytes()
    budget = int(vmem_cap * 0.40)                  # ~25 MiB on v7x, ~51 MiB on v5e/v6e
    per_row_bytes = n * (4 * in_itemsize + 16)     # 2 inputs x 2 buffers + ~4 f32 temps
    tb = max(8, min((budget // per_row_bytes) // 8 * 8, 4096))
    if max_tile_rows is not None:
        tb = max(8, min(tb, (max_tile_rows // 8) * 8))
    b_rounded = ((b + 7) // 8) * 8
    tb = min(tb, b_rounded)

    # ---- grid: (core partitions, batch tiles per partition) ----------------
    n_tiles = -(-b_rounded // tb)
    ncores = num_core_partitions if n_tiles >= 2 else 1
    tiles_per_core = -(-n_tiles // ncores)
    b_pad = ncores * tiles_per_core * tb
    has_padding = b_pad != b
    if has_padding:
        pad = b_pad - b
        anchors = jnp.pad(anchors, ((0, pad), (0, 0)))
        neighbors = jnp.pad(neighbors, ((0, pad), (0, 0)))

    kernel = functools.partial(
        _scan_loss_kernel, true_b=b, tb=tb, tiles_per_core=tiles_per_core,
        cal_entropy=bool(cal_entropy), has_padding=has_padding)

    cost = pl.CostEstimate(
        flops=10 * b_pad * n,
        transcendentals=2 * b_pad * n + 3 * b_pad,
        bytes_accessed=2 * b_pad * n * in_itemsize + 4 * ncores * (n + 1))

    cons_parts, ent_parts = pl.pallas_call(
        kernel,
        out_shape=(
            jax.ShapeDtypeStruct((ncores, 1), jnp.float32),      # partial sum of -log(sim)
            jax.ShapeDtypeStruct((ncores, 1, n), jnp.float32),   # partial col-sum of a_prob
        ),
        grid_spec=pltpu.PrefetchScalarGridSpec(
            num_scalar_prefetch=0,
            grid=(ncores, tiles_per_core),
            in_specs=[
                pl.BlockSpec((tb, n), lambda c, i: (c * tiles_per_core + i, 0)),
                pl.BlockSpec((tb, n), lambda c, i: (c * tiles_per_core + i, 0)),
            ],
            out_specs=(
                pl.BlockSpec((1, 1), lambda c, i: (c, 0),
                             memory_space=pltpu.MemorySpace.SMEM),
                pl.BlockSpec((1, 1, n), lambda c, i: (c, 0, 0)),
            ),
        ),
        compiler_params=pltpu.CompilerParams(
            dimension_semantics=("parallel", "arbitrary"),
            vmem_limit_bytes=min(int(vmem_cap * 0.75), 100 * 1024 * 1024),
        ),
        cost_estimate=cost,
    )(anchors, neighbors)

    consistency_loss = jnp.sum(cons_parts) / b
    if cal_entropy:
        p = jnp.maximum(jnp.sum(ent_parts, axis=0).reshape(-1) / b, 1e-8)
        entropy_loss = -jnp.sum(p * jnp.log(p))
    else:
        entropy_loss = jnp.float32(0.0)
    return consistency_loss - entropy_weight * entropy_loss


def _reference_scan_loss(anchors, neighbors, cal_entropy=False, entropy_weight=2.0):
    """Pure-JAX reference matching the PyTorch module."""
    a_prob = jax.nn.softmax(anchors.astype(jnp.float32), axis=1)
    n_prob = jax.nn.softmax(neighbors.astype(jnp.float32), axis=1)
    sim = jnp.sum(a_prob * n_prob, axis=1)
    consistency = -jnp.mean(jnp.maximum(jnp.log(sim), -100.0))
    if cal_entropy:
        p = jnp.maximum(jnp.mean(a_prob, axis=0), 1e-8)
        ent = -jnp.sum(p * jnp.log(p))
    else:
        ent = 0.0
    return consistency - entropy_weight * ent


if __name__ == "__main__":
    key = jax.random.PRNGKey(0)
    k_a, k_n, k_a2, k_n2 = jax.random.split(key, 4)

    # Small shapes consistent with the module's [b, num_classes] inputs.
    b, num_classes = 8, 16
    anchors = jax.random.normal(k_a, (b, num_classes), dtype=jnp.float32)
    neighbors = jax.random.normal(k_n, (b, num_classes), dtype=jnp.float32)

    loss = scan_loss(anchors, neighbors, cal_entropy=False)
    loss_ent = scan_loss(anchors, neighbors, cal_entropy=True)
    jax.block_until_ready((loss, loss_ent))

    ref = _reference_scan_loss(anchors, neighbors, cal_entropy=False)
    ref_ent = _reference_scan_loss(anchors, neighbors, cal_entropy=True)
    assert jnp.allclose(loss, ref, atol=1e-5, rtol=1e-5), (loss, ref)
    assert jnp.allclose(loss_ent, ref_ent, atol=1e-5, rtol=1e-5), (loss_ent, ref_ent)

    # Multi-tile + core-split + padded-last-tile path (batch not a multiple of the tile).
    b2 = 37
    anchors2 = jax.random.normal(k_a2, (b2, num_classes), dtype=jnp.float32)
    neighbors2 = jax.random.normal(k_n2, (b2, num_classes), dtype=jnp.float32)
    loss2 = scan_loss(anchors2, neighbors2, cal_entropy=True, max_tile_rows=16)
    ref2 = _reference_scan_loss(anchors2, neighbors2, cal_entropy=True)
    jax.block_until_ready(loss2)
    assert jnp.allclose(loss2, ref2, atol=1e-5, rtol=1e-5), (loss2, ref2)

    # bf16 logits stream (kernel upcasts per tile); looser tolerance for the cast.
    a_bf16 = anchors.astype(jnp.bfloat16)
    n_bf16 = neighbors.astype(jnp.bfloat16)
    loss_bf16 = scan_loss(a_bf16, n_bf16, cal_entropy=True)
    ref_bf16 = _reference_scan_loss(a_bf16.astype(jnp.float32),
                                    n_bf16.astype(jnp.float32), cal_entropy=True)
    jax.block_until_ready(loss_bf16)
    assert jnp.allclose(loss_bf16, ref_bf16, atol=5e-3, rtol=5e-3), (loss_bf16, ref_bf16)

    print("KERNEL_OK")
</pallas_src>

<mosaic_0001>
module attributes {stable_mosaic.version = 11 : i64} {
  func.func @_scan_loss_kernel(%arg0: i32, %arg1: i32, %arg2: memref<8x16xf32, #tpu.memory_space<vmem>>, %arg3: memref<8x16xf32, #tpu.memory_space<vmem>>, %arg4: memref<1x1xf32, #tpu.memory_space<smem>>, %arg5: memref<1x1x16xf32, #tpu.memory_space<vmem>>) attributes {dimension_semantics = [#tpu.dimension_semantics<parallel>, #tpu.dimension_semantics<arbitrary>], iteration_bounds = array<i64: 1, 1>, scalar_prefetch = 0 : i64, scratch_operands = 0 : i64, tpu.core_type = #tpu.core_type<tc>, window_params = [{transform_indices = @transform_0, window_bounds = array<i64: 8, 16>}, {transform_indices = @transform_1, window_bounds = array<i64: 8, 16>}, {transform_indices = @transform_2, window_bounds = array<i64: 1, 1>}, {transform_indices = @transform_3, window_bounds = array<i64: 1, 1, 16>}]} {
    %c0_i32 = arith.constant 0 : i32
    %0 = arith.cmpi eq, %arg1, %c0_i32 : i32
    %1 = arith.extui %0 : i1 to i32
    %c0_i32_0 = arith.constant 0 : i32
    %2 = arith.cmpi ne, %1, %c0_i32_0 : i32
    scf.if %2 {
      %cst_15 = arith.constant 0.000000e+00 : f32
      %c0_16 = arith.constant 0 : index
      %c0_17 = arith.constant 0 : index
      %36 = memref.load %arg4[%c0_16, %c0_17] : memref<1x1xf32, #tpu.memory_space<smem>>
      memref.store %cst_15, %arg4[%c0_16, %c0_17] : memref<1x1xf32, #tpu.memory_space<smem>>
    } else {
    }
    %c0 = arith.constant 0 : index
    %c0_1 = arith.constant 0 : index
    %3 = vector.load %arg2[%c0, %c0_1] : memref<8x16xf32, #tpu.memory_space<vmem>>, vector<8x16xf32>
    %c0_2 = arith.constant 0 : index
    %c0_3 = arith.constant 0 : index
    %4 = vector.load %arg3[%c0_2, %c0_3] : memref<8x16xf32, #tpu.memory_space<vmem>>, vector<8x16xf32>
    %cst = arith.constant dense<0xFF800000> : vector<8xf32>
    %5 = vector.multi_reduction <maximumf>, %3, %cst [1] : vector<8x16xf32> to vector<8xf32>
    %6 = vector.shape_cast %5 : vector<8xf32> to vector<8x1xf32>
    %cst_4 = arith.constant dense<0xFF800000> : vector<8xf32>
    %7 = vector.multi_reduction <maximumf>, %4, %cst_4 [1] : vector<8x16xf32> to vector<8xf32>
    %8 = vector.shape_cast %7 : vector<8xf32> to vector<8x1xf32>
    %9 = vector.broadcast %6 : vector<8x1xf32> to vector<8x16xf32>
    %10 = arith.subf %3, %9 : vector<8x16xf32>
    %11 = math.exp %10 : vector<8x16xf32>
    %12 = vector.broadcast %8 : vector<8x1xf32> to vector<8x16xf32>
    %13 = arith.subf %4, %12 : vector<8x16xf32>
    %14 = math.exp %13 : vector<8x16xf32>
    %cst_5 = arith.constant dense<0.000000e+00> : vector<8xf32>
    %15 = vector.multi_reduction <add>, %11, %cst_5 [1] : vector<8x16xf32> to vector<8xf32>
    %16 = vector.shape_cast %15 : vector<8xf32> to vector<8x1xf32>
    %cst_6 = arith.constant dense<0.000000e+00> : vector<8xf32>
    %17 = vector.multi_reduction <add>, %14, %cst_6 [1] : vector<8x16xf32> to vector<8xf32>
    %18 = vector.shape_cast %17 : vector<8xf32> to vector<8x1xf32>
    %19 = arith.mulf %11, %14 : vector<8x16xf32>
    %cst_7 = arith.constant dense<0.000000e+00> : vector<8xf32>
    %20 = vector.multi_reduction <add>, %19, %cst_7 [1] : vector<8x16xf32> to vector<8xf32>
    %21 = vector.shape_cast %20 : vector<8xf32> to vector<8x1xf32>
    %22 = arith.mulf %16, %18 : vector<8x1xf32>
    %23 = arith.divf %21, %22 : vector<8x1xf32>
    %24 = math.log %23 : vector<8x1xf32>
    %cst_8 = arith.constant -1.000000e+02 : f32
    %25 = vector.broadcast %cst_8 : f32 to vector<8x1xf32>
    %26 = arith.maximumf %24, %25 : vector<8x1xf32>
    %cst_9 = arith.constant 0.000000e+00 : f32
    %27 = vector.broadcast %cst_9 : f32 to vector<8x1xf32>
    %28 = arith.subf %27, %26 : vector<8x1xf32>
    %c0_10 = arith.constant 0 : index
    %c0_11 = arith.constant 0 : index
    %29 = memref.load %arg4[%c0_10, %c0_11] : memref<1x1xf32, #tpu.memory_space<smem>>
    %30 = vector.shape_cast %28 : vector<8x1xf32> to vector<1x8x1xf32>
    %cst_12 = arith.constant dense<0.000000e+00> : vector<1xf32>
    %31 = vector.multi_reduction <add>, %30, %cst_12 [1, 2] : vector<1x8x1xf32> to vector<1xf32>
    %32 = vector.shape_cast %31 : vector<1xf32> to vector<1x1x1xf32>
    %33 = vector.extract %32[0, 0, 0] : f32 from vector<1x1x1xf32>
    %34 = arith.addf %29, %33 : f32
    %c0_13 = arith.constant 0 : index
    %c0_14 = arith.constant 0 : index
    %35 = memref.load %arg4[%c0_13, %c0_14] : memref<1x1xf32, #tpu.memory_space<smem>>
    memref.store %34, %arg4[%c0_13, %c0_14] : memref<1x1xf32, #tpu.memory_space<smem>>
    return
  }
  func.func @transform_0(%arg0: i32, %arg1: i32) -> (i32, i32) {
    %c1_i32 = arith.constant 1 : i32
    %0 = arith.muli %arg0, %c1_i32 : i32
    %1 = arith.addi %0, %arg1 : i32
    %c0_i32 = arith.constant 0 : i32
    %c0_i32_0 = arith.constant 0 : i32
    return %1, %c0_i32 : i32, i32
  }
  func.func @transform_1(%arg0: i32, %arg1: i32) -> (i32, i32) {
    %c1_i32 = arith.constant 1 : i32
    %0 = arith.muli %arg0, %c1_i32 : i32
    %1 = arith.addi %0, %arg1 : i32
    %c0_i32 = arith.constant 0 : i32
    %c0_i32_0 = arith.constant 0 : i32
    return %1, %c0_i32 : i32, i32
  }
  func.func @transform_2(%arg0: i32, %arg1: i32) -> (i32, i32) {
    %c0_i32 = arith.constant 0 : i32
    %c0_i32_0 = arith.constant 0 : i32
    return %arg0, %c0_i32 : i32, i32
  }
  func.func @transform_3(%arg0: i32, %arg1: i32) -> (i32, i32, i32) {
    %c0_i32 = arith.constant 0 : i32
    %c0_i32_0 = arith.constant 0 : i32
    %c0_i32_1 = arith.constant 0 : i32
    return %arg0, %c0_i32, %c0_i32_0 : i32, i32, i32
  }
}

</mosaic_0001>

<bundles_post_ra>
// kernel: tpu_custom_call.1
= control target key start
LH: loop header
LB: loop body
LE: loop exit
PB: predicated region body
PF: predicated region fallthrough
CT: control target
= control target key end

     0   :  { %9 = vsyncpa [#allocation3], 0  ;;  %s305_s0 = inlined_call_operand.hbm [shape: f32[8,16], index: 0, kind: input, shape index: {}]   ;;  %s306_s1 = inlined_call_operand.hbm [shape: f32[8,16], index: 1, kind: input, shape index: {}]   ;;  %s307_s2 = inlined_call_operand.hbm [shape: f32[1,1], index: 2, kind: output, shape index: {0}]   ;;  %s308_s3 = inlined_call_operand.hbm [shape: f32[1,1,16], index: 3, kind: output, shape index: {1}]  }
   0x1   :  { %10 = vsyncpa [#allocation7], 0 }
   0x2   :  { %11 = vsyncpa [#allocation5], 0 }
   0x3   :  { %12 = vsyncpa [#allocation4], 0  ;;  %s228_s12 = smov [#allocation2]   ;;  %s229_s14 = smov [#allocation6]  }
   0x4   :  { %s22_s13 = sshll.u32 %s228_s12, 4  ;;  %s35_s15 = sshll.u32 %s229_s14, 4  ;;  %s23_s13 = int_to_ptr.vmem [resolvable:$true] %s22_s13  ;;  %s36_s15 = int_to_ptr.vmem [resolvable:$true] %s35_s15 }
   0x5   :  { %s144_s18 = scalar_lea.hbm %s305_s0, 128 }
   0x6   :  { %p145_p0 = scmp.ne.s32.totalorder %s305_s0, %s144_s18  ;;  %p148_p1 = scmp.lt.u32.totalorder %s144_s18, %s305_s0 }
   0x8   :  { %p150_p2 = pnand %p148_p1, %p145_p0 }
   0xa   :  { %153 = shalt.err (!%p150_p2)
}
   0xb   :  { %s154_s23 = scalar_lea.vmem %s23_s13, 128  ;;  %p159_p4 = scmp.lt.s32.totalorder %s23_s13, %s23_s13 }
   0xc   :  { %p155_p3 = scmp.ne.s32.totalorder %s23_s13, %s154_s23  ;;  %p160_p5 = scmp.lt.s32.totalorder %s154_s23, %s154_s23 }
   0xe   :  { %p161_p6 = por %p160_p5, %p159_p4 }
  0x10   :  { %p162_p7 = pnand %p161_p6, %p155_p3 }
  0x12   :  { %165 = shalt.err (!%p162_p7)
}
  0x13   :  { %25 = dma.hbm_to_vmem [thread:$0]  %s305_s0, 128, %s23_s13, [#allocation3]  }
  0x14   :  { %s166_s28 = scalar_lea.hbm %s306_s1, 128 }
  0x15   :  { %p167_p8 = scmp.ne.s32.totalorder %s306_s1, %s166_s28  ;;  %p170_p9 = scmp.lt.u32.totalorder %s166_s28, %s306_s1 }
  0x17   :  { %p172_p10 = pnand %p170_p9, %p167_p8 }
  0x19   :  { %175 = shalt.err (!%p172_p10)
}
  0x1a   :  { %s176_s6 = scalar_lea.vmem %s36_s15, 128  ;;  %p181_p12 = scmp.lt.s32.totalorder %s36_s15, %s36_s15 }
  0x1b   :  { %p177_p11 = scmp.ne.s32.totalorder %s36_s15, %s176_s6  ;;  %p182_p13 = scmp.lt.s32.totalorder %s176_s6, %s176_s6 }
  0x1d   :  { %p183_p0 = por %p182_p13, %p181_p12 }
  0x1f   :  { %p184_p1 = pnand %p183_p0, %p177_p11 }
  0x21   :  { %187 = shalt.err (!%p184_p1)
}
  0x22   :  { %38 = dma.hbm_to_vmem [thread:$0]  %s306_s1, 128, %s36_s15, [#allocation7]  }
  0x23   :  { %220 = dma.done.wait [#allocation3], 128  }
  0x24   :  { %221 = vsyncadd [#allocation3], 4294967168 }
  0x25   :  { %222 = dma.done.wait [#allocation7], 128  }
  0x26   :  { %223 = vsyncadd [#allocation7], 4294967168  ;;  %vm55_vm0 = vcmask 130048   ;;  %v53_v0 = vld [vmem:[#allocation2] sm:$0xff]  ;;  %v54_v1 = vld [vmem:[#allocation6] sm:$0xff]  ;;  %vm86_vm1 = vcmask 7168  }
  0x27   :  { %v56_v2 = vsel %vm55_vm0, %v53_v0, -inf  ;;  %v59_v3 = vsel %vm55_vm0, %v54_v1, -inf  ;;  %s230_s1 = smov [#allocation9]  }
  0x28   :  { %57 = vmax.xlane.f32.xlu0 %v56_v2  ;;  %s114_s8 = sshll.u32 %s230_s1, 4  ;;  %s115_s8 = int_to_ptr.vmem [resolvable:$true] %s114_s8 }
  0x29   :  { %s188_s9 = scalar_lea.vmem %s115_s8, 16  ;;  %s192_s10 = scalar_lea.vmem %s115_s8, 32 }
  0x2a   :  { %p189_p2 = scmp.ne.s32.totalorder %s115_s8, %s188_s9  ;;  %p193_p3 = scmp.lt.s32.totalorder %s115_s8, %s115_s8 }
  0x2b   :  { %p194_p4 = scmp.lt.s32.totalorder %s192_s10, %s188_s9 }
  0x2c   :  { %60 = vmax.xlane.f32.xlu0 %v59_v3 }
  0x2d   :  { %p195_p5 = por %p194_p4, %p193_p3 }
  0x2f   :  { %p196_p6 = pnand %p195_p5, %p189_p2 }
  0xb5   :  { %v58_v4 = vpop.xlane.xlu0 %57 }
  0xb6   :  { %v62_v5 = vsub.f32 %v53_v0, %v58_v4 }
  0xb8   :  { %v63_v6 = vmul.f32 1.442695, %v62_v5 }
  0xb9   :  { %v61_v7 = vpop.xlane.xlu0 %60 }
  0xba   :  { %136 = vpow2.f32 %v63_v6  ;;  %v65_v8 = vsub.f32 %v54_v1, %v61_v7 }
  0xbc   :  { %v66_v9 = vmul.f32 1.442695, %v65_v8 }
  0xbe   :  { %138 = vpow2.f32 %v66_v9 }
  0xc4   :  { %v137_v10 = vpop.eup %136 }
  0xc5   :  { %v68_v11 = vsel %vm55_vm0, %v137_v10, 0.0 }
  0xc6   :  { %69 = vadd.xlane.f32.xlu1 %v68_v11 }
  0xc8   :  { %v139_v12 = vpop.eup %138 }
  0xc9   :  { %v71_v13 = vsel %vm55_vm0, %v139_v12, 0.0  ;;  %v74_v14 = vmul.f32 %v139_v12, %v137_v10 }
  0xca   :  { %72 = vadd.xlane.f32.xlu1 %v71_v13 }
  0xcb   :  { %v75_v15 = vsel %vm55_vm0, %v74_v14, 0.0 }
  0xcc   :  { %76 = vadd.xlane.f32.xlu0 %v75_v15 }
 0x153   :  { %v70_v16 = vpop.xlane.xlu1 %69 }
 0x157   :  { %v73_v17 = vpop.xlane.xlu1 %72 }
 0x158   :  { %v78_v18 = vmul.f32 %v73_v17, %v70_v16 }
 0x159   :  { %v77_v20 = vpop.xlane.xlu0 %76 }
 0x15a   :  { %140 = vrcp.f32 %v78_v18 }
 0x164   :  { %v141_v19 = vpop.eup %140 }
 0x165   :  { %v80_v21 = vmul.f32 %v141_v19, %v77_v20 }
 0x167   :  { %142 = vlog2.f32 %v80_v21 }
 0x171   :  { %v143_v22 = vpop.eup %142 }
 0x172   :  { %v82_v23 = vmul.f32 0.6931472, %v143_v22 }
 0x174   :  { %v83_v24 = vmax.f32 %v82_v23, -100.0 }
 0x176   :  { %v84_v25 = vsub.f32 0.0, %v83_v24 }
 0x178   :  { %v87_v26 = vsel %vm86_vm1, %v84_v25, 0.0 }
 0x179   :  { %88 = vadd.xlane.f32.xlu1 %v87_v26 }
 0x17a   :  { %199 = shalt.err (!%p196_p6)
}
 0x17b   :  { %s200_s13 = scalar_lea.hbm %s308_s3, 16 }
 0x17c   :  { %p201_p7 = scmp.ne.s32.totalorder %s308_s3, %s200_s13  ;;  %p204_p8 = scmp.lt.u32.totalorder %s200_s13, %s308_s3 }
 0x17e   :  { %p206_p9 = pnand %p204_p8, %p201_p7 }
 0x180   :  { %209 = shalt.err (!%p206_p9)
}
 0x181   :  { %117 = dma.vmem_to_hbm [thread:$0]  %s115_s8, 16, %s308_s3, [#allocation4]  }
 0x182   :  { %s210_s23 = scalar_lea.hbm %s307_s2, 16 }
 0x183   :  { %p211_p10 = scmp.ne.s32.totalorder %s307_s2, %s210_s23  ;;  %p214_p11 = scmp.lt.u32.totalorder %s210_s23, %s307_s2 }
 0x185   :  { %p216_p12 = pnand %p214_p11, %p211_p10 }
 0x206   :  { %v89_v27 = vpop.xlane.xlu1 %88 }
 0x207   :  { %v90_v28 = vrot.slane %v89_v27, 4 }
 0x209   :  { %v91_v29 = vadd.f32 %v90_v28, %v89_v27 }
 0x20b   :  { %v92_v30 = vrot.slane %v91_v29, 2 }
 0x20d   :  { %v93_v31 = vadd.f32 %v92_v30, %v91_v29 }
 0x20f   :  { %v94_v32 = vrot.slane %v93_v31, 1 }
 0x211   :  { %v95_v33 = vadd.f32 %v94_v32, %v93_v31 }
 0x213   :  { %129 = vpush %v95_v33 }
 0x244   :  { %s130_s20 = spop %129 }
 0x245   :  { %99 = sst [smem:[#allocation8]] %s130_s20 }
 0x246   :  { %219 = shalt.err (!%p216_p12)
}
 0x247   :  { %s231_s27 = smov [#allocation8]  }
 0x248   :  { %107 = dma.smem_to_hbm %s231_s27, 16, %s307_s2, [#allocation5]  }
 0x249   :  { %224 = dma.done.wait [#allocation5], 16  }
 0x24a   :  { %225 = vsyncadd [#allocation5], 4294967280 }
 0x24b   :  { %226 = dma.done.wait [#allocation4], 16  }
 0x24c   :  { %227 = vsyncadd [#allocation4], 4294967280 }
 0x24d   :  { %124 = sfence }
 0x24e   :  { %125 = vsyncpa [#allocation3], 1 }
 0x24f   :  { %126 = vsyncpa [#allocation7], 1 }
 0x250   :  { %127 = vsyncpa [#allocation4], 1 }
 0x251   :  { %128 = vsyncpa [#allocation5], 1 }

</bundles_post_ra>
